<compile_context>
chip_gen: v5e
topology: v5e:2x2
jax: 0.10.0
libtpu: 0.0.40
codegen_flags: <defaults>
</compile_context>

<pallas_src>
import jax
import jax.numpy as jnp
from jax.experimental import pallas as pl
from jax.experimental.pallas import tpu as pltpu

LOG_SIG_MAX = 2.0
LOG_SIG_MIN = -20.0

DIM_EMB = 100     # GaussianPolicy.dim_emb (folded away inside the kernel)
HEAD_PAD = 128    # fused mean|logstd head padded to one lane tile


def _cdiv(a, b):
    return -(-a // b)


def _round_up(x, m):
    return _cdiv(x, m) * m


def _choose_tb(B, tb):
    """Multiple of 16 (bf16 sublanes), minimal padding, >=2 grid steps when the
    batch allows (so the parallel grid axis can shard across both TCs on v7x)."""
    n_tiles = _cdiv(B, tb)
    if B > 16:
        n_tiles = max(n_tiles, 2)
    return _round_up(_cdiv(B, n_tiles), 16)


def _gaussian_policy_kernel(x_ref, w1_ref, b1_ref, w2_ref, b2_ref,
                            wf_ref, bf_ref, head_ref):
    # Layer 1: h1 = relu(x @ W1 + b1)   (cast to bf16 in-kernel, f32 accumulate)
    x = x_ref[...].astype(jnp.bfloat16)
    h1 = jnp.dot(x, w1_ref[...], preferred_element_type=jnp.float32)
    h1 = jnp.maximum(h1 + b1_ref[...], 0.0)

    # Layer 2: h2 = relu(h1 @ W2 + b2)
    h2 = jnp.dot(h1.astype(jnp.bfloat16), w2_ref[...],
                 preferred_element_type=jnp.float32)
    h2 = jnp.maximum(h2 + b2_ref[...], 0.0)

    # Folded embedding + mean|logstd head: one [512, 128] matmul.
    head = jnp.dot(h2.astype(jnp.bfloat16), wf_ref[...],
                   preferred_element_type=jnp.float32)
    head = head + bf_ref[...]

    # Lane-dense bf16 slab; clamp of logstd lanes happens in the wrapper.
    head_ref[...] = head.astype(head_ref.dtype)


def init_params(key, dim_in, act_dim, layers=(512, 512), dim_emb=DIM_EMB):
    """Deterministic init mirroring torch.nn.Linear default
    (U[-1/sqrt(fan_in), 1/sqrt(fan_in)]).  Weights stored [in, out]."""
    def linear(k, fan_in, fan_out):
        kw, kb = jax.random.split(k)
        bound = 1.0 / jnp.sqrt(jnp.float32(fan_in))
        w = jax.random.uniform(kw, (fan_in, fan_out), jnp.float32, -bound, bound)
        b = jax.random.uniform(kb, (1, fan_out), jnp.float32, -bound, bound)
        return w, b

    ks = jax.random.split(key, 5)
    w1, b1 = linear(ks[0], dim_in, layers[0])
    w2, b2 = linear(ks[1], layers[0], layers[1])
    w3, b3 = linear(ks[2], layers[1], dim_emb)
    wm, bm = linear(ks[3], dim_emb, act_dim)
    ws, bs = linear(ks[4], dim_emb, act_dim)
    return dict(w1=w1, b1=b1, w2=w2, b2=b2, w3=w3, b3=b3,
                wm=wm, bm=bm, ws=ws, bs=bs)


def pack_params(params, obs_dim, goal_dim):
    """One-time layout transform: fold W3 with the fused mean|logstd head (in
    f32, single bf16 rounding), pad the head to 128 lanes, cast matmul weights
    to bf16 (biases stay f32)."""
    act_dim = params["wm"].shape[1]
    dim_emb = params["w3"].shape[1]
    dim_in = obs_dim + goal_dim
    assert params["w1"].shape[0] == dim_in, (
        f"W1 rows {params['w1'].shape[0]} != obs_dim+goal_dim {dim_in}")
    assert params["wm"].shape[0] == dim_emb and params["ws"].shape[0] == dim_emb
    assert 2 * act_dim <= HEAD_PAD, f"2*act_dim={2*act_dim} exceeds {HEAD_PAD} lanes"

    bf16 = jnp.bfloat16
    f32 = jnp.float32

    # Fused [mean | logstd] head, then fold the embedding layer into it (f32).
    wh = jnp.concatenate([params["wm"], params["ws"]], axis=1)   # [dim_emb, 2*act]
    bh = jnp.concatenate([params["bm"], params["bs"]], axis=1)   # [1, 2*act]
    wf = params["w3"].astype(f32) @ wh.astype(f32)               # [512, 2*act]
    bf_ = params["b3"].astype(f32) @ wh.astype(f32) + bh.astype(f32)
    wf = jnp.pad(wf, ((0, 0), (0, HEAD_PAD - 2 * act_dim)))
    bf_ = jnp.pad(bf_, ((0, 0), (0, HEAD_PAD - 2 * act_dim)))

    return dict(
        w1=params["w1"].astype(bf16), b1=params["b1"].astype(f32),
        w2=params["w2"].astype(bf16), b2=params["b2"].astype(f32),
        wf=wf.astype(bf16), bf=bf_.astype(f32),
        act_dim=act_dim)


def _whole_spec(a):
    """Resident weight/bias: constant block index, single-buffered (it is never
    re-fetched, so >1 buffer is wasted VMEM)."""
    idx = lambda i: (0, 0)
    try:
        return pl.BlockSpec(a.shape, idx, pipeline_mode=pl.Buffered(1))
    except TypeError:  # older BlockSpec without pipeline_mode
        return pl.BlockSpec(a.shape, idx)


def gaussian_policy_forward(obs, goal, packed, tb=512):
    """obs: [B, ...], goal: [B, ...]. Returns (mean [B, act], logstd [B, act])."""
    B = obs.shape[0]
    # Fold the torch.cat into the wrapper; keep f32 (no extra cast pass over HBM).
    x = jnp.concatenate([obs.reshape(B, -1), goal.reshape(B, -1)],
                        axis=1).astype(jnp.float32)
    dim_in = x.shape[1]
    act_dim = packed["act_dim"]
    assert packed["w1"].shape[0] == dim_in, (
        f"packed W1 expects dim_in={packed['w1'].shape[0]}, got {dim_in}")

    TB = _choose_tb(B, tb)
    Bp = _round_up(B, TB)
    if Bp != B:
        x = jnp.pad(x, ((0, Bp - B), (0, 0)))

    h1_dim = packed["w1"].shape[1]
    h2_dim = packed["w2"].shape[1]
    weight_bytes = sum(int(v.size) * v.dtype.itemsize
                       for k, v in packed.items() if k != "act_dim")
    flops = 2 * Bp * (dim_in * h1_dim + h1_dim * h2_dim + h2_dim * HEAD_PAD)
    bytes_accessed = weight_bytes + Bp * dim_in * 4 + Bp * HEAD_PAD * 2

    # Rough per-step VMEM footprint: double-buffered I/O tiles, single-buffered
    # weights, f32 h1/h2 intermediates.  Raise the scoped-VMEM limit only when
    # needed (v5e default is 16 MiB).
    vmem_est = (2 * TB * dim_in * 4
                + 2 * TB * HEAD_PAD * 2
                + weight_bytes
                + 2 * TB * max(h1_dim, h2_dim) * 4)
    cp_kwargs = dict(dimension_semantics=("parallel",))
    if vmem_est > 12 * 1024 * 1024:
        cp_kwargs["vmem_limit_bytes"] = min(int(vmem_est * 3 // 2), 64 * 1024 * 1024)

    head = pl.pallas_call(
        _gaussian_policy_kernel,
        grid=(Bp // TB,),
        in_specs=[
            pl.BlockSpec((TB, dim_in), lambda i: (i, 0)),
            _whole_spec(packed["w1"]), _whole_spec(packed["b1"]),
            _whole_spec(packed["w2"]), _whole_spec(packed["b2"]),
            _whole_spec(packed["wf"]), _whole_spec(packed["bf"]),
        ],
        out_specs=pl.BlockSpec((TB, HEAD_PAD), lambda i: (i, 0)),
        out_shape=jax.ShapeDtypeStruct((Bp, HEAD_PAD), jnp.bfloat16),
        compiler_params=pltpu.CompilerParams(**cp_kwargs),
        cost_estimate=pl.CostEstimate(flops=flops, transcendentals=0,
                                      bytes_accessed=bytes_accessed),
    )(x,
      packed["w1"], packed["b1"],
      packed["w2"], packed["b2"],
      packed["wf"], packed["bf"])

    mean = head[:B, :act_dim].astype(jnp.float32)
    logstd = jnp.clip(head[:B, act_dim:2 * act_dim].astype(jnp.float32),
                      LOG_SIG_MIN, LOG_SIG_MAX)
    return mean, logstd


def reference_forward(obs, goal, params):
    """Pure-JAX f32 reference (mirrors the torch module exactly)."""
    x = jnp.concatenate([obs.reshape(obs.shape[0], -1),
                         goal.reshape(goal.shape[0], -1)], axis=1).astype(jnp.float32)
    h1 = jnp.maximum(x @ params["w1"] + params["b1"], 0.0)
    h2 = jnp.maximum(h1 @ params["w2"] + params["b2"], 0.0)
    z = h2 @ params["w3"] + params["b3"]
    mean = z @ params["wm"] + params["bm"]
    logstd = jnp.clip(z @ params["ws"] + params["bs"], LOG_SIG_MIN, LOG_SIG_MAX)
    return mean, logstd


if __name__ == "__main__":
    # Small synthetic env: obs_dim=16, goal_dim=16, action_dim=4, batch=2.
    B, OBS_DIM, GOAL_DIM, ACT_DIM = 2, 16, 16, 4

    key = jax.random.PRNGKey(0)
    k_obs, k_goal, k_par = jax.random.split(key, 3)

    obs = jax.random.normal(k_obs, (B, OBS_DIM), jnp.float32)
    goal = jax.random.normal(k_goal, (B, GOAL_DIM), jnp.float32)
    params = init_params(k_par, OBS_DIM + GOAL_DIM, ACT_DIM)
    packed = pack_params(params, OBS_DIM, GOAL_DIM)

    mean, logstd = gaussian_policy_forward(obs, goal, packed)
    jax.block_until_ready((mean, logstd))

    assert mean.shape == (B, ACT_DIM) and logstd.shape == (B, ACT_DIM)
    assert bool(jnp.all(logstd >= LOG_SIG_MIN)) and bool(jnp.all(logstd <= LOG_SIG_MAX))

    # Correctness vs. pure-JAX f32 reference (loose tolerance: bf16 MXU operands
    # and bf16 output slab).
    mean_ref, logstd_ref = reference_forward(obs, goal, params)
    assert jnp.allclose(mean, mean_ref, atol=5e-2, rtol=5e-2)
    assert jnp.allclose(logstd, logstd_ref, atol=5e-2, rtol=5e-2)

    print("KERNEL_OK")
</pallas_src>

<mosaic_0001>
module attributes {stable_mosaic.version = 11 : i64} {
  func.func @_gaussian_policy_kernel(%arg0: i32, %arg1: memref<16x32xf32, #tpu.memory_space<vmem>>, %arg2: memref<32x512xbf16, #tpu.memory_space<vmem>>, %arg3: memref<1x512xf32, #tpu.memory_space<vmem>>, %arg4: memref<512x512xbf16, #tpu.memory_space<vmem>>, %arg5: memref<1x512xf32, #tpu.memory_space<vmem>>, %arg6: memref<512x128xbf16, #tpu.memory_space<vmem>>, %arg7: memref<1x128xf32, #tpu.memory_space<vmem>>, %arg8: memref<16x128xbf16, #tpu.memory_space<vmem>>) attributes {dimension_semantics = [#tpu.dimension_semantics<parallel>], iteration_bounds = array<i64: 1>, scalar_prefetch = 0 : i64, scratch_operands = 0 : i64, tpu.core_type = #tpu.core_type<tc>, window_params = [{transform_indices = @transform_0, window_bounds = array<i64: 16, 32>}, {pipeline_mode = #tpu.pipeline_mode<synchronous>, transform_indices = @transform_1, window_bounds = array<i64: 32, 512>}, {pipeline_mode = #tpu.pipeline_mode<synchronous>, transform_indices = @transform_2, window_bounds = array<i64: 1, 512>}, {pipeline_mode = #tpu.pipeline_mode<synchronous>, transform_indices = @transform_3, window_bounds = array<i64: 512, 512>}, {pipeline_mode = #tpu.pipeline_mode<synchronous>, transform_indices = @transform_4, window_bounds = array<i64: 1, 512>}, {pipeline_mode = #tpu.pipeline_mode<synchronous>, transform_indices = @transform_5, window_bounds = array<i64: 512, 128>}, {pipeline_mode = #tpu.pipeline_mode<synchronous>, transform_indices = @transform_6, window_bounds = array<i64: 1, 128>}, {transform_indices = @transform_7, window_bounds = array<i64: 16, 128>}]} {
    %c0 = arith.constant 0 : index
    %c0_0 = arith.constant 0 : index
    %0 = vector.load %arg1[%c0, %c0_0] : memref<16x32xf32, #tpu.memory_space<vmem>>, vector<16x32xf32>
    %1 = arith.truncf %0 : vector<16x32xf32> to vector<16x32xbf16>
    %c0_1 = arith.constant 0 : index
    %c0_2 = arith.constant 0 : index
    %2 = vector.load %arg2[%c0_1, %c0_2] : memref<32x512xbf16, #tpu.memory_space<vmem>>, vector<32x512xbf16>
    %cst = arith.constant dense<0.000000e+00> : vector<16x512xf32>
    %3 = tpu.matmul %1, %2, %cst {dimension_numbers = #tpu.dot_dimension_numbers<[1], [0], [0], [1], [0, 0, 1, 1], [], []>} : vector<16x32xbf16>, vector<32x512xbf16>, vector<16x512xf32> -> vector<16x512xf32>
    %c0_3 = arith.constant 0 : index
    %c0_4 = arith.constant 0 : index
    %4 = vector.load %arg3[%c0_3, %c0_4] : memref<1x512xf32, #tpu.memory_space<vmem>>, vector<1x512xf32>
    %5 = vector.broadcast %4 : vector<1x512xf32> to vector<16x512xf32>
    %6 = arith.addf %3, %5 : vector<16x512xf32>
    %cst_5 = arith.constant 0.000000e+00 : f32
    %7 = vector.broadcast %cst_5 : f32 to vector<16x512xf32>
    %8 = arith.maximumf %6, %7 : vector<16x512xf32>
    %9 = arith.truncf %8 : vector<16x512xf32> to vector<16x512xbf16>
    %c0_6 = arith.constant 0 : index
    %c0_7 = arith.constant 0 : index
    %10 = vector.load %arg4[%c0_6, %c0_7] : memref<512x512xbf16, #tpu.memory_space<vmem>>, vector<512x512xbf16>
    %cst_8 = arith.constant dense<0.000000e+00> : vector<16x512xf32>
    %11 = tpu.matmul %9, %10, %cst_8 {dimension_numbers = #tpu.dot_dimension_numbers<[1], [0], [0], [1], [0, 0, 1, 1], [], []>} : vector<16x512xbf16>, vector<512x512xbf16>, vector<16x512xf32> -> vector<16x512xf32>
    %c0_9 = arith.constant 0 : index
    %c0_10 = arith.constant 0 : index
    %12 = vector.load %arg5[%c0_9, %c0_10] : memref<1x512xf32, #tpu.memory_space<vmem>>, vector<1x512xf32>
    %13 = vector.broadcast %12 : vector<1x512xf32> to vector<16x512xf32>
    %14 = arith.addf %11, %13 : vector<16x512xf32>
    %cst_11 = arith.constant 0.000000e+00 : f32
    %15 = vector.broadcast %cst_11 : f32 to vector<16x512xf32>
    %16 = arith.maximumf %14, %15 : vector<16x512xf32>
    %17 = arith.truncf %16 : vector<16x512xf32> to vector<16x512xbf16>
    %c0_12 = arith.constant 0 : index
    %c0_13 = arith.constant 0 : index
    %18 = vector.load %arg6[%c0_12, %c0_13] : memref<512x128xbf16, #tpu.memory_space<vmem>>, vector<512x128xbf16>
    %cst_14 = arith.constant dense<0.000000e+00> : vector<16x128xf32>
    %19 = tpu.matmul %17, %18, %cst_14 {dimension_numbers = #tpu.dot_dimension_numbers<[1], [0], [0], [1], [0, 0, 1, 1], [], []>} : vector<16x512xbf16>, vector<512x128xbf16>, vector<16x128xf32> -> vector<16x128xf32>
    %c0_15 = arith.constant 0 : index
    %c0_16 = arith.constant 0 : index
    %20 = vector.load %arg7[%c0_15, %c0_16] : memref<1x128xf32, #tpu.memory_space<vmem>>, vector<1x128xf32>
    %21 = vector.broadcast %20 : vector<1x128xf32> to vector<16x128xf32>
    %22 = arith.addf %19, %21 : vector<16x128xf32>
    %23 = arith.truncf %22 : vector<16x128xf32> to vector<16x128xbf16>
    %c0_17 = arith.constant 0 : index
    %c0_18 = arith.constant 0 : index
    %24 = vector.load %arg8[%c0_17, %c0_18] : memref<16x128xbf16, #tpu.memory_space<vmem>>, vector<16x128xbf16>
    tpu.vector_store %arg8[%c0_17, %c0_18], %23 {strides = array<i32>} : memref<16x128xbf16, #tpu.memory_space<vmem>>, vector<16x128xbf16>,
    return
  }
  func.func @transform_0(%arg0: i32) -> (i32, i32) {
    %c0_i32 = arith.constant 0 : i32
    %c0_i32_0 = arith.constant 0 : i32
    return %arg0, %c0_i32 : i32, i32
  }
  func.func @transform_1(%arg0: i32) -> (i32, i32) {
    %c0_i32 = arith.constant 0 : i32
    %c0_i32_0 = arith.constant 0 : i32
    %c0_i32_1 = arith.constant 0 : i32
    return %c0_i32, %c0_i32_0 : i32, i32
  }
  func.func @transform_2(%arg0: i32) -> (i32, i32) {
    %c0_i32 = arith.constant 0 : i32
    %c0_i32_0 = arith.constant 0 : i32
    %c0_i32_1 = arith.constant 0 : i32
    return %c0_i32, %c0_i32_0 : i32, i32
  }
  func.func @transform_3(%arg0: i32) -> (i32, i32) {
    %c0_i32 = arith.constant 0 : i32
    %c0_i32_0 = arith.constant 0 : i32
    %c0_i32_1 = arith.constant 0 : i32
    return %c0_i32, %c0_i32_0 : i32, i32
  }
  func.func @transform_4(%arg0: i32) -> (i32, i32) {
    %c0_i32 = arith.constant 0 : i32
    %c0_i32_0 = arith.constant 0 : i32
    %c0_i32_1 = arith.constant 0 : i32
    return %c0_i32, %c0_i32_0 : i32, i32
  }
  func.func @transform_5(%arg0: i32) -> (i32, i32) {
    %c0_i32 = arith.constant 0 : i32
    %c0_i32_0 = arith.constant 0 : i32
    %c0_i32_1 = arith.constant 0 : i32
    return %c0_i32, %c0_i32_0 : i32, i32
  }
  func.func @transform_6(%arg0: i32) -> (i32, i32) {
    %c0_i32 = arith.constant 0 : i32
    %c0_i32_0 = arith.constant 0 : i32
    %c0_i32_1 = arith.constant 0 : i32
    return %c0_i32, %c0_i32_0 : i32, i32
  }
  func.func @transform_7(%arg0: i32) -> (i32, i32) {
    %c0_i32 = arith.constant 0 : i32
    %c0_i32_0 = arith.constant 0 : i32
    return %arg0, %c0_i32 : i32, i32
  }
}

</mosaic_0001>

<bundles_post_ra>
// kernel: tpu_custom_call.1
= control target key start
LH: loop header
LB: loop body
LE: loop exit
PB: predicated region body
PF: predicated region fallthrough
CT: control target
= control target key end

     0   :  { %12 = vsyncpa [#allocation3], 0  ;;  %s2765_s0 = inlined_call_operand.hbm [shape: f32[16,32], index: 0, kind: input, shape index: {}]   ;;  %s2766_s1 = inlined_call_operand.hbm [shape: bf16[32,512], index: 1, kind: input, shape index: {}]   ;;  %s2767_s2 = inlined_call_operand.hbm [shape: f32[1,512], index: 2, kind: input, shape index: {}]   ;;  %s2768_s3 = inlined_call_operand.hbm [shape: bf16[512,512], index: 3, kind: input, shape index: {}]   ;;  %s2769_s4 = inlined_call_operand.hbm [shape: f32[1,512], index: 4, kind: input, shape index: {}]   ;;  %s2770_s5 = inlined_call_operand.hbm [shape: bf16[512,128], index: 5, kind: input, shape index: {}]   ;;  %s2771_s6 = inlined_call_operand.vmem [shape: f32[1,128], index: 6, kind: input, shape index: {}]   ;;  %s2772_s7 = inlined_call_operand.hbm [shape: bf16[16,128], index: 7, kind: output, shape index: {}]  }
   0x1   :  { %13 = vsyncpa [#allocation6], 0 }
   0x2   :  { %14 = vsyncpa [#allocation9], 0 }
   0x3   :  { %15 = vsyncpa [#allocation12], 0  ;;  %s34_s26 = sshll.u32 %s2766_s1, 4  ;;  %s35_s26 = int_to_ptr.hbm [resolvable:$true] %s34_s26 }
   0x4   :  { %16 = vsyncpa [#allocation4], 0  ;;  %s2648_s27 = smov [#allocation5]   ;;  %s58_s8 = sshll.u32 %s2768_s3, 4  ;;  %s59_s8 = int_to_ptr.hbm [resolvable:$true] %s58_s8 }
   0x5   :  { %s36_s28 = sshll.u32 %s2648_s27, 4  ;;  %s2649_s9 = smov 256   ;;  %s37_s28 = int_to_ptr.vmem [resolvable:$true] %s36_s28 }
   0x6   :  { %s2650_s10 = smov 16   ;;  %s2651_s11 = smov [#allocation8]  }
   0x7   :  { %42 = dma.hbm_to_vmem [thread:$0]  %s35_s26, 1024, %s37_s28, [#allocation6], %s2649_s9, %s2649_s9, %s2650_s10  }
   0x8   :  { %s60_s12 = sshll.u32 %s2651_s11, 4  ;;  %s21_s15 = sshll.u32 %s2765_s0, 4  ;;  %s61_s12 = int_to_ptr.vmem [resolvable:$true] %s60_s12  ;;  %s22_s15 = int_to_ptr.hbm [resolvable:$true] %s21_s15 }
   0x9   :  { %66 = dma.hbm_to_vmem [thread:$0]  %s59_s8, 16384, %s61_s12, [#allocation9], %s2649_s9, %s2649_s9, %s2650_s10  }
   0xa   :  { %s2652_s1 = smov [#allocation2]   ;;  %s48_s3 = sshll.u32 %s2767_s2, 4  ;;  %s49_s3 = int_to_ptr.hbm [resolvable:$true] %s48_s3 }
   0xb   :  { %s23_s16 = sshll.u32 %s2652_s1, 4  ;;  %s2653_s19 = smov 128   ;;  %s24_s16 = int_to_ptr.vmem [resolvable:$true] %s23_s16 }
   0xc   :  { %s2654_s20 = smov 8   ;;  %s2655_s21 = smov [#allocation7]  }
   0xd   :  { %29 = dma.hbm_to_vmem [thread:$0]  %s22_s15, 256, %s24_s16, [#allocation3], %s2653_s19, %s2653_s19, %s2654_s20  }
   0xe   :  { %s50_s22 = sshll.u32 %s2655_s21, 4  ;;  %s72_s0 = sshll.u32 %s2769_s4, 4  ;;  %s51_s22 = int_to_ptr.vmem [resolvable:$true] %s50_s22  ;;  %s73_s0 = int_to_ptr.hbm [resolvable:$true] %s72_s0 }
   0xf   :  { %53 = dma.hbm_to_vmem [thread:$0]  %s49_s3, 64, %s51_s22, [#allocation6]  }
  0x10   :  { %s82_s27 = sshll.u32 %s2770_s5, 4  ;;  %s2656_s28 = smov [#allocation10]   ;;  %s83_s27 = int_to_ptr.hbm [resolvable:$true] %s82_s27 }
  0x11   :  { %s74_s29 = sshll.u32 %s2656_s28, 4  ;;  %s2657_s2 = smov [#allocation11]   ;;  %s75_s29 = int_to_ptr.vmem [resolvable:$true] %s74_s29 }
  0x12   :  { %77 = dma.hbm_to_vmem [thread:$0]  %s73_s0, 64, %s75_s29, [#allocation9]  }
  0x13   :  { %s84_s30 = sshll.u32 %s2657_s2, 4  ;;  %s2658_s8 = smov 64   ;;  %s85_s30 = int_to_ptr.vmem [resolvable:$true] %s84_s30 }
  0x14   :  { %s2659_s9 = smov 4  }
  0x15   :  { %90 = dma.hbm_to_vmem [thread:$0]  %s83_s27, 4096, %s85_s30, [#allocation12], %s2658_s8, %s2658_s8, %s2659_s9  }
  0x16   :  { %2638 = dma.done.wait [#allocation3], 256  }
  0x17   :  { %2639 = vsyncadd [#allocation3], 4294967040 }
  0x18   :  { %2640 = dma.done.wait [#allocation6], 1088  }
  0x19   :  { %2641 = vsyncadd [#allocation6], 4294966208 }
  0x1a   :  { %2642 = dma.done.wait [#allocation9], 16448  }
  0x1b   :  { %2643 = vsyncadd [#allocation9], 4294950848 }
  0x1c   :  { %2644 = dma.done.wait [#allocation12], 4096  }
  0x1d   :  { %2645 = vsyncadd [#allocation12], 4294963200  ;;  %v1625_v0 = vld [vmem:[#allocation5 + $0x20] sm:$0xf]  ;;  %v2289_v1 = vld [vmem:[#allocation5 + $0x2c] sm:$0xf0] }
  0x1e   :  { %v2287_v2 = vld [vmem:[#allocation5 + $0x24] sm:$0xf]  ;;  %v1626_v3 = vor.u32 %v2289_v1, %v1625_v0  ;;  %v1627_v4 = vld [vmem:[#allocation5 + $0x30] sm:$0xf0]  ;;  %v1633_v5 = vld [vmem:[#allocation5 + $0x28] sm:$0xf] }
  0x1f   :  { %v2290_v6 = vld [vmem:[#allocation5 + $0x34] sm:$0xf0]  ;;  %v1630_v7 = vor.u32 %v2287_v2, %v1627_v4  ;;  %v2288_v9 = vld [vmem:[#allocation5 + $0x2c] sm:$0xf]  ;;  %v1635_v10 = vld [vmem:[#allocation5 + $0x38] sm:$0xf0] }
  0x20   :  { %v1634_v8 = vor.u32 %v2290_v6, %v1633_v5  ;;  %v1609_v11 = vld [vmem:[#allocation5] sm:$0xf]  ;;  %189 = vmatpush.bf16.msra.mxu0 %v1626_v3  ;;  %v1638_v12 = vor.u32 %v2288_v9, %v1635_v10  ;;  %v2285_v13 = vld [vmem:[#allocation5 + $0xc] sm:$0xf0]  ;;  %v2283_v14 = vld [vmem:[#allocation5 + $0x4] sm:$0xf] }
  0x21   :  { %v1611_v15 = vld [vmem:[#allocation5 + $0x10] sm:$0xf0]  ;;  %203 = vmatpush.bf16.msra.mxu1 %v1630_v7  ;;  %v1610_v16 = vor.u32 %v2285_v13, %v1609_v11  ;;  %v1617_v18 = vld [vmem:[#allocation5 + $0x8] sm:$0xf]  ;;  %v2286_v19 = vld [vmem:[#allocation5 + $0x14] sm:$0xf0] }
  0x22   :  { %217 = vmatpush.bf16.msra.mxu2 %v1634_v8  ;;  %v1614_v17 = vor.u32 %v2283_v14, %v1611_v15  ;;  %v2284_v20 = vld [vmem:[#allocation5 + $0xc] sm:$0xf]  ;;  %231 = vmatpush.bf16.msra.mxu3 %v1638_v12  ;;  %v1618_v21 = vor.u32 %v2286_v19, %v1617_v18  ;;  %v1619_v22 = vld [vmem:[#allocation5 + $0x18] sm:$0xf0]  ;;  %v118_v23 = vld [vmem:[#allocation2] sm:$0xff]  ;;  %vm179_vm0 = vcmask 261120  }
  0x23   :  { %v119_v24 = vld [vmem:[#allocation2 + $0x8] sm:$0xff]  ;;  %v1622_v25 = vor.u32 %v2284_v20, %v1619_v22  ;;  %v1757_v27 = vld [vmem:[#allocation8 + $0xe0] sm:$0xf]  ;;  %v2321_v28 = vld [vmem:[#allocation8 + $0xec] sm:$0xf0]  ;;  %s2660_s10 = smov [#allocation13]  }
  0x24   :  { %v120_v26 = vpack.c.bf16 %v119_v24, %v118_v23  ;;  %v1885_v29 = vld [vmem:[#allocation8 + $0x1e0] sm:$0xf]  ;;  %190 = vmatpush.bf16.msra.mxu0 %v1610_v16  ;;  %v1758_v30 = vor.u32 %v2321_v28, %v1757_v27  ;;  %v2353_v31 = vld [vmem:[#allocation8 + $0x1ec] sm:$0xf0]  ;;  %s1589_s11 = sshll.u32 %s2660_s10, 4  ;;  %s1591_s14 = sshll.u32 %s2772_s7, 4  ;;  %s1590_s11 = int_to_ptr.vmem [resolvable:$true] %s1589_s11  ;;  %s1592_s14 = int_to_ptr.hbm [resolvable:$true] %s1591_s14 }
  0x25   :  { %v1741_v32 = vld [vmem:[#allocation8 + $0xc0] sm:$0xf]  ;;  %v2317_v33 = vld [vmem:[#allocation8 + $0xcc] sm:$0xf0]  ;;  %204 = vmatpush.bf16.msra.mxu1 %v1614_v17  ;;  %v1886_v34 = vor.u32 %v2353_v31, %v1885_v29 }
  0x26   :  { %218 = vmatpush.bf16.msra.mxu2 %v1618_v21  ;;  %v1869_v35 = vld [vmem:[#allocation8 + $0x1c0] sm:$0xf]  ;;  %v2349_v36 = vld [vmem:[#allocation8 + $0x1cc] sm:$0xf0]  ;;  %232 = vmatpush.bf16.msra.mxu3 %v1622_v25  ;;  %v1742_v38 = vor.u32 %v2317_v33, %v1741_v32 }
  0x27   :  { %v2013_v37 = vld [vmem:[#allocation8 + $0x2e0] sm:$0xf]  ;;  %v2385_v39 = vld [vmem:[#allocation8 + $0x2ec] sm:$0xf0]  ;;  %1639 = vmatmul.msk.bf16.vlgmr.msra.gmra.mxu0 %vm179_vm0, %v120_v26  ;;  %v1870_v42 = vor.u32 %v2349_v36, %v1869_v35 }
  0x28   :  { %1029 = vmatpush.bf16.msrb.mxu0 %v1758_v30  ;;  %v2141_v40 = vld [vmem:[#allocation8 + $0x3e0] sm:$0xf]  ;;  %v2417_v41 = vld [vmem:[#allocation8 + $0x3ec] sm:$0xf0]  ;;  %v2014_v43 = vor.u32 %v2385_v39, %v2013_v37  ;;  %1640 = vmatmul.msk.bf16.vlgmr.msra.gmra.mxu1 %vm179_vm0, %v120_v26 }
  0x29   :  { %1043 = vmatpush.bf16.msrb.mxu1 %v1886_v34  ;;  %v2142_v44 = vor.u32 %v2417_v41, %v2141_v40  ;;  %v1725_v45 = vld [vmem:[#allocation8 + $0xa0] sm:$0xf]  ;;  %v2313_v46 = vld [vmem:[#allocation8 + $0xac] sm:$0xf0]  ;;  %1641 = vmatmul.msk.bf16.vlgmr.msra.gmra.mxu2 %vm179_vm0, %v120_v26 }
  0x2a   :  { %v1853_v47 = vld [vmem:[#allocation8 + $0x1a0] sm:$0xf]  ;;  %v2345_v48 = vld [vmem:[#allocation8 + $0x1ac] sm:$0xf0]  ;;  %1642 = vmatmul.msk.bf16.vlgmr.msra.gmra.mxu3 %vm179_vm0, %v120_v26  ;;  %1057 = vmatpush.bf16.msrb.mxu2 %v2014_v43  ;;  %v1726_v54 = vor.u32 %v2313_v46, %v1725_v45 }
  0x2b   :  { %v1997_v49 = vld [vmem:[#allocation8 + $0x2c0] sm:$0xf]  ;;  %v2381_v50 = vld [vmem:[#allocation8 + $0x2cc] sm:$0xf0]  ;;  %1071 = vmatpush.bf16.msrb.mxu3 %v2142_v44  ;;  %v1854_v58 = vor.u32 %v2345_v48, %v1853_v47 }
  0x2c   :  { %v1998_v51 = vor.u32 %v2381_v50, %v1997_v49  ;;  %v2125_v52 = vld [vmem:[#allocation8 + $0x3c0] sm:$0xf]  ;;  %v2413_v53 = vld [vmem:[#allocation8 + $0x3cc] sm:$0xf0]  ;;  %1030 = vmatpush.bf16.msrb.mxu0 %v1742_v38  ;;  %v2319_v49 = vld [vmem:[#allocation8 + $0xe4] sm:$0xf] }
  0x2d   :  { %v2126_v55 = vor.u32 %v2413_v53, %v2125_v52  ;;  %v1709_v56 = vld [vmem:[#allocation8 + $0x80] sm:$0xf]  ;;  %v2309_v57 = vld [vmem:[#allocation8 + $0x8c] sm:$0xf0]  ;;  %1044 = vmatpush.bf16.msrb.mxu1 %v1870_v42  ;;  %v1759_v50 = vld [vmem:[#allocation8 + $0xf0] sm:$0xf0] }
  0x2e   :  { %v1981_v59 = vld [vmem:[#allocation8 + $0x2a0] sm:$0xf]  ;;  %v2377_v60 = vld [vmem:[#allocation8 + $0x2ac] sm:$0xf0]  ;;  %1058 = vmatpush.bf16.msrb.mxu2 %v1998_v51  ;;  %v1710_v2 = vor.u32 %v2309_v57, %v1709_v56  ;;  %v2351_v51 = vld [vmem:[#allocation8 + $0x1e4] sm:$0xf] }
  0x2f   :  { %v2109_v61 = vld [vmem:[#allocation8 + $0x3a0] sm:$0xf]  ;;  %v2341_v63 = vld [vmem:[#allocation8 + $0x18c] sm:$0xf0]  ;;  %v1982_v1 = vor.u32 %v2377_v60, %v1981_v59  ;;  %1072 = vmatpush.bf16.msrb.mxu3 %v2126_v55  ;;  %v1887_v52 = vld [vmem:[#allocation8 + $0x1f0] sm:$0xf0] }
  0x30   :  { %v1837_v62 = vld [vmem:[#allocation8 + $0x180] sm:$0xf]  ;;  %v2409_v0 = vld [vmem:[#allocation8 + $0x3ac] sm:$0xf0]  ;;  %1031 = vmatpush.bf16.msrb.mxu0 %v1726_v54  ;;  %v2315_v56 = vld [vmem:[#allocation8 + $0xc4] sm:$0xf] }
  0x31   :  { %v2110_v3 = vor.u32 %v2409_v0, %v2109_v61  ;;  %v1693_v4 = vld [vmem:[#allocation8 + $0x60] sm:$0xf]  ;;  %v2373_v6 = vld [vmem:[#allocation8 + $0x28c] sm:$0xf0]  ;;  %1045 = vmatpush.bf16.msrb.mxu1 %v1854_v58  ;;  %v1838_v7 = vor.u32 %v2341_v63, %v1837_v62  ;;  %v1743_v57 = vld [vmem:[#allocation8 + $0xd0] sm:$0xf0]  ;;  %v1762_v62 = vor.u32 %v2319_v49, %v1759_v50 }
  0x32   :  { %v1965_v5 = vld [vmem:[#allocation8 + $0x280] sm:$0xf]  ;;  %v2305_v8 = vld [vmem:[#allocation8 + $0x6c] sm:$0xf0]  ;;  %1059 = vmatpush.bf16.msrb.mxu2 %v1982_v1  ;;  %v2383_v0 = vld [vmem:[#allocation8 + $0x2e4] sm:$0xf] }
  0x33   :  { %v2093_v9 = vld [vmem:[#allocation8 + $0x380] sm:$0xf]  ;;  %v2405_v10 = vld [vmem:[#allocation8 + $0x38c] sm:$0xf0]  ;;  %v1966_v13 = vor.u32 %v2373_v6, %v1965_v5  ;;  %1073 = vmatpush.bf16.msrb.mxu3 %v2110_v3  ;;  %v1694_v14 = vor.u32 %v2305_v8, %v1693_v4  ;;  %v2015_v1 = vld [vmem:[#allocation8 + $0x2f0] sm:$0xf0] }
  0x34   :  { %v1821_v11 = vld [vmem:[#allocation8 + $0x160] sm:$0xf]  ;;  %v2337_v12 = vld [vmem:[#allocation8 + $0x16c] sm:$0xf0]  ;;  %1032 = vmatpush.bf16.msrb.mxu0 %v1710_v2  ;;  %v2094_v15 = vor.u32 %v2405_v10, %v2093_v9  ;;  %v1890_v2 = vor.u32 %v2351_v51, %v1887_v52  ;;  %v2415_v3 = vld [vmem:[#allocation8 + $0x3e4] sm:$0xf]  ;;  %v2018_v9 = vor.u32 %v2383_v0, %v2015_v1  ;;  %v1746_v10 = vor.u32 %v2315_v56, %v1743_v57 }
  0x35   :  { %v1677_v16 = vld [vmem:[#allocation8 + $0x40] sm:$0xf]  ;;  %v2369_v18 = vld [vmem:[#allocation8 + $0x26c] sm:$0xf0]  ;;  %1046 = vmatpush.bf16.msrb.mxu1 %v1838_v7  ;;  %v1822_v19 = vor.u32 %v2337_v12, %v1821_v11  ;;  %v2143_v4 = vld [vmem:[#allocation8 + $0x3f0] sm:$0xf0] }
  0x36   :  { %v1949_v17 = vld [vmem:[#allocation8 + $0x260] sm:$0xf]  ;;  %v2301_v20 = vld [vmem:[#allocation8 + $0x4c] sm:$0xf0]  ;;  %1060 = vmatpush.bf16.msrb.mxu2 %v1966_v13  ;;  %v2347_v5 = vld [vmem:[#allocation8 + $0x1c4] sm:$0xf]  ;;  %v2146_v11 = vor.u32 %v2415_v3, %v2143_v4 }
  0x37   :  { %v2077_v21 = vld [vmem:[#allocation8 + $0x360] sm:$0xf]  ;;  %v2401_v22 = vld [vmem:[#allocation8 + $0x36c] sm:$0xf0]  ;;  %v1950_v25 = vor.u32 %v2369_v18, %v1949_v17  ;;  %1074 = vmatpush.bf16.msrb.mxu3 %v2094_v15  ;;  %v1678_v26 = vor.u32 %v2301_v20, %v1677_v16  ;;  %v1871_v6 = vld [vmem:[#allocation8 + $0x1d0] sm:$0xf0] }
  0x38   :  { %v1805_v23 = vld [vmem:[#allocation8 + $0x140] sm:$0xf]  ;;  %v2333_v24 = vld [vmem:[#allocation8 + $0x14c] sm:$0xf0]  ;;  %1033 = vmatpush.bf16.msrb.mxu0 %v1694_v14  ;;  %v2078_v27 = vor.u32 %v2401_v22, %v2077_v21  ;;  %v2311_v12 = vld [vmem:[#allocation8 + $0xa4] sm:$0xf]  ;;  %v1874_v15 = vor.u32 %v2347_v5, %v1871_v6 }
  0x39   :  { %v1661_v28 = vld [vmem:[#allocation8 + $0x20] sm:$0xf]  ;;  %v2365_v30 = vld [vmem:[#allocation8 + $0x24c] sm:$0xf0]  ;;  %1047 = vmatpush.bf16.msrb.mxu1 %v1822_v19  ;;  %v1806_v31 = vor.u32 %v2333_v24, %v1805_v23  ;;  %v2379_v13 = vld [vmem:[#allocation8 + $0x2c4] sm:$0xf] }
  0x3a   :  { %v1933_v29 = vld [vmem:[#allocation8 + $0x240] sm:$0xf]  ;;  %v2297_v32 = vld [vmem:[#allocation8 + $0x2c] sm:$0xf0]  ;;  %1061 = vmatpush.bf16.msrb.mxu2 %v1950_v25  ;;  %v1999_v14 = vld [vmem:[#allocation8 + $0x2d0] sm:$0xf0] }
  0x3b   :  { %v2061_v33 = vld [vmem:[#allocation8 + $0x340] sm:$0xf]  ;;  %v2397_v34 = vld [vmem:[#allocation8 + $0x34c] sm:$0xf0]  ;;  %v1934_v37 = vor.u32 %v2365_v30, %v1933_v29  ;;  %1075 = vmatpush.bf16.msrb.mxu3 %v2078_v27  ;;  %v1662_v39 = vor.u32 %v2297_v32, %v1661_v28  ;;  %v1727_v16 = vld [vmem:[#allocation8 + $0xb0] sm:$0xf0]  ;;  %v2002_v21 = vor.u32 %v2379_v13, %v1999_v14 }
  0x3c   :  { %v1789_v35 = vld [vmem:[#allocation8 + $0x120] sm:$0xf]  ;;  %v2329_v36 = vld [vmem:[#allocation8 + $0x12c] sm:$0xf0]  ;;  %1034 = vmatpush.bf16.msrb.mxu0 %v1678_v26  ;;  %v2062_v40 = vor.u32 %v2397_v34, %v2061_v33  ;;  %v2411_v17 = vld [vmem:[#allocation8 + $0x3c4] sm:$0xf]  ;;  %v1730_v22 = vor.u32 %v2311_v12, %v1727_v16 }
  0x3d   :  { %v1645_v38 = vld [vmem:[#allocation8] sm:$0xf]  ;;  %v2293_v41 = vld [vmem:[#allocation8 + $0xc] sm:$0xf0]  ;;  %1048 = vmatpush.bf16.msrb.mxu1 %v1806_v31  ;;  %v1790_v44 = vor.u32 %v2329_v36, %v1789_v35  ;;  %v2127_v18 = vld [vmem:[#allocation8 + $0x3d0] sm:$0xf0] }
  0x3e   :  { %v1917_v42 = vld [vmem:[#allocation8 + $0x220] sm:$0xf]  ;;  %v2361_v43 = vld [vmem:[#allocation8 + $0x22c] sm:$0xf0]  ;;  %1062 = vmatpush.bf16.msrb.mxu2 %v1934_v37  ;;  %v1646_v54 = vor.u32 %v2293_v41, %v1645_v38  ;;  %v2343_v19 = vld [vmem:[#allocation8 + $0x1a4] sm:$0xf]  ;;  %v2130_v23 = vor.u32 %v2411_v17, %v2127_v18 }
  0x3f   :  { %v1773_v45 = vld [vmem:[#allocation8 + $0x100] sm:$0xf]  ;;  %v2393_v47 = vld [vmem:[#allocation8 + $0x32c] sm:$0xf0]  ;;  %v1918_v53 = vor.u32 %v2361_v43, %v1917_v42  ;;  %1076 = vmatpush.bf16.msrb.mxu3 %v2062_v40  ;;  %v1855_v20 = vld [vmem:[#allocation8 + $0x1b0] sm:$0xf0] }
  0x40   :  { %v2045_v46 = vld [vmem:[#allocation8 + $0x320] sm:$0xf]  ;;  %v2325_v48 = vld [vmem:[#allocation8 + $0x10c] sm:$0xf0]  ;;  %1035 = vmatpush.bf16.msrb.mxu0 %v1662_v39  ;;  %v1858_v24 = vor.u32 %v2343_v19, %v1855_v20  ;;  %v2307_v25 = vld [vmem:[#allocation8 + $0x84] sm:$0xf] }
  0x41   :  { %v2046_v55 = vor.u32 %v2393_v47, %v2045_v46  ;;  %v1901_v58 = vld [vmem:[#allocation8 + $0x200] sm:$0xf]  ;;  %v2357_v59 = vld [vmem:[#allocation8 + $0x20c] sm:$0xf0]  ;;  %1049 = vmatpush.bf16.msrb.mxu1 %v1790_v44  ;;  %v1774_v61 = vor.u32 %v2325_v48, %v1773_v45  ;;  %v1711_v26 = vld [vmem:[#allocation8 + $0x90] sm:$0xf0] }
  0x42   :  { %v2029_v60 = vld [vmem:[#allocation8 + $0x300] sm:$0xf]  ;;  %v2389_v63 = vld [vmem:[#allocation8 + $0x30c] sm:$0xf0]  ;;  %1063 = vmatpush.bf16.msrb.mxu2 %v1918_v53  ;;  %v1902_v7 = vor.u32 %v2357_v59, %v1901_v58  ;;  %v2339_v27 = vld [vmem:[#allocation8 + $0x184] sm:$0xf]  ;;  %v1714_v29 = vor.u32 %v2307_v25, %v1711_v26 }
  0x43   :  { %1077 = vmatpush.bf16.msrb.mxu3 %v2046_v55  ;;  %v2030_v8 = vor.u32 %v2389_v63, %v2029_v60  ;;  %v1839_v28 = vld [vmem:[#allocation8 + $0x190] sm:$0xf0]  ;;  %v2375_v31 = vld [vmem:[#allocation8 + $0x2a4] sm:$0xf] }
  0x44   :  { %1036 = vmatpush.bf16.msrb.mxu0 %v1646_v54  ;;  %v1842_v30 = vor.u32 %v2339_v27, %v1839_v28  ;;  %v1983_v32 = vld [vmem:[#allocation8 + $0x2b0] sm:$0xf0]  ;;  %v2407_v33 = vld [vmem:[#allocation8 + $0x3a4] sm:$0xf]  ;;  %v129_v27 = vld [vmem:[#allocation7] sm:$0xf] }
  0x45   :  { %1050 = vmatpush.bf16.msrb.mxu1 %v1774_v61  ;;  %v1986_v34 = vor.u32 %v2375_v31, %v1983_v32  ;;  %v2111_v35 = vld [vmem:[#allocation8 + $0x3b0] sm:$0xf0]  ;;  %v2303_v37 = vld [vmem:[#allocation8 + $0x64] sm:$0xf]  ;;  %v132_v31 = vperm.slane %v129_v27, 1 }
  0x46   :  { %1064 = vmatpush.bf16.msrb.mxu2 %v1902_v7  ;;  %v2114_v36 = vor.u32 %v2407_v33, %v2111_v35  ;;  %v1695_v38 = vld [vmem:[#allocation8 + $0x70] sm:$0xf0]  ;;  %v2335_v39 = vld [vmem:[#allocation8 + $0x164] sm:$0xf] }
  0x47   :  { %1078 = vmatpush.bf16.msrb.mxu3 %v2030_v8  ;;  %v1698_v40 = vor.u32 %v2303_v37, %v1695_v38  ;;  %v1823_v41 = vld [vmem:[#allocation8 + $0x170] sm:$0xf0]  ;;  %v2371_v43 = vld [vmem:[#allocation8 + $0x284] sm:$0xf] }
  0x48   :  { %1085 = vmatpush.bf16.msra.mxu0 %v1762_v62  ;;  %v1826_v42 = vor.u32 %v2335_v39, %v1823_v41  ;;  %v1967_v44 = vld [vmem:[#allocation8 + $0x290] sm:$0xf0]  ;;  %v2403_v46 = vld [vmem:[#allocation8 + $0x384] sm:$0xf]  ;;  %v2322_v41 = vld [vmem:[#allocation8 + $0xf4] sm:$0xf0] }
  0x49   :  { %1099 = vmatpush.bf16.msra.mxu1 %v1890_v2  ;;  %v1970_v45 = vor.u32 %v2371_v43, %v1967_v44  ;;  %v2095_v47 = vld [vmem:[#allocation8 + $0x390] sm:$0xf0]  ;;  %v2299_v49 = vld [vmem:[#allocation8 + $0x44] sm:$0xf]  ;;  %v133_v43 = vperm.slane %v129_v27, 2 }
  0x4a   :  { %1113 = vmatpush.bf16.msra.mxu2 %v2018_v9  ;;  %v2098_v48 = vor.u32 %v2403_v46, %v2095_v47  ;;  %v1679_v50 = vld [vmem:[#allocation8 + $0x50] sm:$0xf0]  ;;  %v2331_v51 = vld [vmem:[#allocation8 + $0x144] sm:$0xf]  ;;  %v2354_v46 = vld [vmem:[#allocation8 + $0x1f4] sm:$0xf0] }
  0x4b   :  { %1127 = vmatpush.bf16.msra.mxu3 %v2146_v11  ;;  %v1682_v52 = vor.u32 %v2299_v49, %v1679_v50  ;;  %v1807_v53 = vld [vmem:[#allocation8 + $0x150] sm:$0xf0]  ;;  %v2367_v55 = vld [vmem:[#allocation8 + $0x264] sm:$0xf]  ;;  %v134_v47 = vperm.slane %v129_v27, 3 }
  0x4c   :  { %1086 = vmatpush.bf16.msra.mxu0 %v1746_v10  ;;  %v1810_v54 = vor.u32 %v2331_v51, %v1807_v53  ;;  %v1951_v56 = vld [vmem:[#allocation8 + $0x270] sm:$0xf0]  ;;  %v2399_v57 = vld [vmem:[#allocation8 + $0x364] sm:$0xf]  ;;  %v1749_v53 = vld [vmem:[#allocation8 + $0xc8] sm:$0xf] }
  0x4d   :  { %1100 = vmatpush.bf16.msra.mxu1 %v1874_v15  ;;  %v1954_v58 = vor.u32 %v2367_v55, %v1951_v56  ;;  %v2079_v59 = vld [vmem:[#allocation8 + $0x370] sm:$0xf0]  ;;  %v2295_v61 = vld [vmem:[#allocation8 + $0x24] sm:$0xf] }
  0x4e   :  { %1114 = vmatpush.bf16.msra.mxu2 %v2002_v21  ;;  %v2082_v60 = vor.u32 %v2399_v57, %v2079_v59  ;;  %v1663_v62 = vld [vmem:[#allocation8 + $0x30] sm:$0xf0]  ;;  %v2327_v0 = vld [vmem:[#allocation8 + $0x124] sm:$0xf]  ;;  %v1877_v57 = vld [vmem:[#allocation8 + $0x1c8] sm:$0xf] }
  0x4f   :  { %1128 = vmatpush.bf16.msra.mxu3 %v2130_v23  ;;  %v1666_v63 = vor.u32 %v2295_v61, %v1663_v62  ;;  %v1791_v1 = vld [vmem:[#allocation8 + $0x130] sm:$0xf0]  ;;  %v2363_v3 = vld [vmem:[#allocation8 + $0x244] sm:$0xf] }
  0x50   :  { %1087 = vmatpush.bf16.msra.mxu0 %v1730_v22  ;;  %v1794_v2 = vor.u32 %v2327_v0, %v1791_v1  ;;  %v1935_v4 = vld [vmem:[#allocation8 + $0x250] sm:$0xf0]  ;;  %v2395_v5 = vld [vmem:[#allocation8 + $0x344] sm:$0xf]  ;;  %v2021_v0 = vld [vmem:[#allocation8 + $0x2e8] sm:$0xf] }
  0x51   :  { %1101 = vmatpush.bf16.msra.mxu1 %v1858_v24  ;;  %v1938_v6 = vor.u32 %v2363_v3, %v1935_v4  ;;  %v2063_v7 = vld [vmem:[#allocation8 + $0x350] sm:$0xf0]  ;;  %v2291_v9 = vld [vmem:[#allocation8 + $0x4] sm:$0xf]  ;;  %v2386_v1 = vld [vmem:[#allocation8 + $0x2f4] sm:$0xf0] }
  0x52   :  { %1115 = vmatpush.bf16.msra.mxu2 %v1986_v34  ;;  %v2066_v8 = vor.u32 %v2395_v5, %v2063_v7  ;;  %v1647_v10 = vld [vmem:[#allocation8 + $0x10] sm:$0xf0]  ;;  %v2323_v11 = vld [vmem:[#allocation8 + $0x104] sm:$0xf]  ;;  %v2418_v5 = vld [vmem:[#allocation8 + $0x3f4] sm:$0xf0] }
  0x53   :  { %1129 = vmatpush.bf16.msra.mxu3 %v2114_v36  ;;  %v1650_v12 = vor.u32 %v2291_v9, %v1647_v10  ;;  %v1775_v13 = vld [vmem:[#allocation8 + $0x110] sm:$0xf0]  ;;  %v2359_v15 = vld [vmem:[#allocation8 + $0x224] sm:$0xf]  ;;  %v2314_v7 = vld [vmem:[#allocation8 + $0xb4] sm:$0xf0] }
  0x54   :  { %1088 = vmatpush.bf16.msra.mxu0 %v1714_v29  ;;  %v1778_v14 = vor.u32 %v2323_v11, %v1775_v13  ;;  %v1919_v16 = vld [vmem:[#allocation8 + $0x230] sm:$0xf0]  ;;  %v2391_v17 = vld [vmem:[#allocation8 + $0x324] sm:$0xf]  ;;  %v131_v29 = vperm.slane %v129_v27, 0 }
  0x55   :  { %1102 = vmatpush.bf16.msra.mxu1 %v1842_v30  ;;  %v2047_v18 = vld [vmem:[#allocation8 + $0x330] sm:$0xf0]  ;;  %v1922_v19 = vor.u32 %v2359_v15, %v1919_v16  ;;  %v2355_v21 = vld [vmem:[#allocation8 + $0x204] sm:$0xf]  ;;  %v1861_v10 = vld [vmem:[#allocation8 + $0x1a8] sm:$0xf] }
  0x56   :  { %1116 = vmatpush.bf16.msra.mxu2 %v1970_v45  ;;  %v2050_v20 = vor.u32 %v2391_v17, %v2047_v18  ;;  %v1903_v22 = vld [vmem:[#allocation8 + $0x210] sm:$0xf0]  ;;  %v2387_v24 = vld [vmem:[#allocation8 + $0x304] sm:$0xf]  ;;  %v1893_v45 = vld [vmem:[#allocation8 + $0x1e8] sm:$0xf] }
  0x57   :  { %1130 = vmatpush.bf16.msra.mxu3 %v2098_v48  ;;  %v1906_v23 = vor.u32 %v2355_v21, %v1903_v22  ;;  %v2031_v25 = vld [vmem:[#allocation8 + $0x310] sm:$0xf0]  ;;  %v2346_v11 = vld [vmem:[#allocation8 + $0x1b4] sm:$0xf0]  ;;  %v2005_v18 = vld [vmem:[#allocation8 + $0x2c8] sm:$0xf] }
  0x58   :  { %1089 = vmatpush.bf16.msra.mxu0 %v1698_v40  ;;  %v2034_v26 = vor.u32 %v2387_v24, %v2031_v25  ;;  %v1765_v40 = vld [vmem:[#allocation8 + $0xe8] sm:$0xf]  ;;  %v1862_v22 = vor.u32 %v2346_v11, %v1861_v10  ;;  %v2310_v25 = vld [vmem:[#allocation8 + $0x94] sm:$0xf0] }
  0x59   :  { %1103 = vmatpush.bf16.msra.mxu1 %v1826_v42  ;;  %v1766_v50 = vor.u32 %v2322_v41, %v1765_v40  ;;  %v1717_v24 = vld [vmem:[#allocation8 + $0x88] sm:$0xf]  ;;  %v2342_v27 = vld [vmem:[#allocation8 + $0x194] sm:$0xf0] }
  0x5a   :  { %1117 = vmatpush.bf16.msra.mxu2 %v1954_v58  ;;  %v2350_v58 = vld [vmem:[#allocation8 + $0x1d4] sm:$0xf0]  ;;  %v1653_v10 = vld [vmem:[#allocation8 + $0x8] sm:$0xf] }
  0x5b   :  { %1131 = vmatpush.bf16.msra.mxu3 %v2082_v60  ;;  %v1878_v4 = vor.u32 %v2350_v58, %v1877_v57  ;;  %v2370_v57 = vld [vmem:[#allocation8 + $0x274] sm:$0xf0] }
  0x5c   :  { %1090 = vmatpush.bf16.msra.mxu0 %v1682_v52  ;;  %v1894_v52 = vor.u32 %v2354_v46, %v1893_v45  ;;  %v2101_v46 = vld [vmem:[#allocation8 + $0x388] sm:$0xf]  ;;  %v2294_v11 = vld [vmem:[#allocation8 + $0x14] sm:$0xf0] }
  0x5d   :  { %1104 = vmatpush.bf16.msra.mxu1 %v1810_v54  ;;  %v2318_v54 = vld [vmem:[#allocation8 + $0xd4] sm:$0xf0] }
  0x5e   :  { %1118 = vmatpush.bf16.msra.mxu2 %v1938_v6  ;;  %v1733_v6 = vld [vmem:[#allocation8 + $0xa8] sm:$0xf] }
  0x5f   :  { %1132 = vmatpush.bf16.msra.mxu3 %v2066_v8  ;;  %v1734_v17 = vor.u32 %v2314_v7, %v1733_v6  ;;  %v2069_v6 = vld [vmem:[#allocation8 + $0x348] sm:$0xf] }
  0x60   :  { %1091 = vmatpush.bf16.msra.mxu0 %v1666_v63  ;;  %v1750_v63 = vor.u32 %v2318_v54, %v1749_v53 }
  0x61   :  { %1105 = vmatpush.bf16.msra.mxu1 %v1794_v2  ;;  %v2149_v2 = vld [vmem:[#allocation8 + $0x3e8] sm:$0xf] }
  0x62   :  { %1119 = vmatpush.bf16.msra.mxu2 %v1922_v19  ;;  %v2150_v16 = vor.u32 %v2418_v5, %v2149_v2  ;;  %v2382_v19 = vld [vmem:[#allocation8 + $0x2d4] sm:$0xf0] }
  0x63   :  { %1133 = vmatpush.bf16.msra.mxu3 %v2050_v20  ;;  %v2133_v20 = vld [vmem:[#allocation8 + $0x3c8] sm:$0xf]  ;;  %v2366_v5 = vld [vmem:[#allocation8 + $0x254] sm:$0xf0] }
  0x64   :  { %1092 = vmatpush.bf16.msra.mxu0 %v1650_v12 }
  0x65   :  { %1106 = vmatpush.bf16.msra.mxu1 %v1778_v14  ;;  %v2022_v14 = vor.u32 %v2386_v1, %v2021_v0  ;;  %v1797_v0 = vld [vmem:[#allocation8 + $0x128] sm:$0xf]  ;;  %v2330_v1 = vld [vmem:[#allocation8 + $0x134] sm:$0xf0] }
  0x66   :  { %1120 = vmatpush.bf16.msra.mxu2 %v1906_v23  ;;  %v2414_v23 = vld [vmem:[#allocation8 + $0x3d4] sm:$0xf0] }
  0x67   :  { %1134 = vmatpush.bf16.msra.mxu3 %v2034_v26  ;;  %v1845_v26 = vld [vmem:[#allocation8 + $0x188] sm:$0xf] }
  0xa4   :  { %v192_v28 = vpop.f32.mrf.mxu0 }
  0xa5   :  { %v206_v30 = vpop.f32.mrf.mxu1  ;;  %v193_v32 = vadd.f32 %v192_v28, %v131_v29  ;;  %v2006_v28 = vor.u32 %v2382_v19, %v2005_v18  ;;  %v2352_v18 = vld [vmem:[#allocation8 + $0x1ec] sm:$0xf]  ;;  %v1895_v19 = vld [vmem:[#allocation8 + $0x1f8] sm:$0xf0] }
  0xa6   :  { %v207_v33 = vadd.f32 %v206_v30, %v132_v31  ;;  %v1718_v30 = vor.u32 %v2310_v25, %v1717_v24  ;;  %v1654_v24 = vor.u32 %v2294_v11, %v1653_v10  ;;  %v2304_v10 = vld [vmem:[#allocation8 + $0x6c] sm:$0xf]  ;;  %v1703_v11 = vld [vmem:[#allocation8 + $0x78] sm:$0xf0] }
  0xa7   :  { %v239_v37 = vmax.f32 %v193_v32, 0.0  ;;  %v2378_v32 = vld [vmem:[#allocation8 + $0x2b4] sm:$0xf0] }
  0xa8   :  { %v240_v42 = vmax.f32 %v207_v33, 0.0  ;;  %v1846_v33 = vor.u32 %v2342_v27, %v1845_v26  ;;  %v2053_v26 = vld [vmem:[#allocation8 + $0x328] sm:$0xf]  ;;  %v2394_v27 = vld [vmem:[#allocation8 + $0x334] sm:$0xf0] }
  0xac   :  { %v220_v34 = vpop.f32.mrf.mxu2  ;;  %v194_v36 = vpop.f32.mrf.mxu0 }
  0xad   :  { %v234_v35 = vpop.f32.mrf.mxu3  ;;  %v195_v38 = vadd.f32 %v194_v36, %v131_v29  ;;  %v208_v39 = vpop.f32.mrf.mxu1  ;;  %v221_v55 = vadd.f32 %v220_v34, %v133_v43  ;;  %v2134_v29 = vor.u32 %v2414_v23, %v2133_v20  ;;  %v2117_v34 = vld [vmem:[#allocation8 + $0x3a8] sm:$0xf]  ;;  %v2362_v23 = vld [vmem:[#allocation8 + $0x234] sm:$0xf0] }
  0xae   :  { %v209_v44 = vadd.f32 %v208_v39, %v132_v31  ;;  %v235_v59 = vadd.f32 %v234_v35, %v134_v47  ;;  %v1989_v31 = vld [vmem:[#allocation8 + $0x2a8] sm:$0xf]  ;;  %v2410_v35 = vld [vmem:[#allocation8 + $0x3b4] sm:$0xf0] }
  0xaf   :  { %v243_v48 = vmax.f32 %v195_v38, 0.0  ;;  %v241_v8 = vmax.f32 %v221_v55, 0.0  ;;  %v1701_v36 = vld [vmem:[#allocation8 + $0x68] sm:$0xf]  ;;  %v2338_v39 = vld [vmem:[#allocation8 + $0x174] sm:$0xf0]  ;;  %v1990_v40 = vor.u32 %v2378_v32, %v1989_v31  ;;  %v2118_v41 = vor.u32 %v2410_v35, %v2117_v34 }
  0xb0   :  { %v244_v49 = vmax.f32 %v209_v44, 0.0  ;;  %v242_v12 = vmax.f32 %v235_v59, 0.0  ;;  %v1829_v38 = vld [vmem:[#allocation8 + $0x168] sm:$0xf]  ;;  %v1751_v32 = vld [vmem:[#allocation8 + $0xd8] sm:$0xf0]  ;;  %v2054_v35 = vor.u32 %v2394_v27, %v2053_v26 }
  0xb1   :  { %v2726_v51 = vpack.c.bf16 %v243_v48, %v239_v37  ;;  %v2306_v37 = vld [vmem:[#allocation8 + $0x74] sm:$0xf0]  ;;  %v1830_v45 = vor.u32 %v2338_v39, %v1829_v38  ;;  %v1685_v48 = vld [vmem:[#allocation8 + $0x48] sm:$0xf]  ;;  %v1879_v34 = vld [vmem:[#allocation8 + $0x1d8] sm:$0xf0] }
  0xb2   :  { %v2728_v56 = vpack.c.bf16 %v244_v49, %v240_v42  ;;  %v1973_v42 = vld [vmem:[#allocation8 + $0x288] sm:$0xf]  ;;  %v1702_v44 = vor.u32 %v2306_v37, %v1701_v36  ;;  %v2302_v49 = vld [vmem:[#allocation8 + $0x54] sm:$0xf0]  ;;  %v2332_v26 = vld [vmem:[#allocation8 + $0x14c] sm:$0xf] }
  0xb3   :  { %1037 = vmatmul.bf16.vlgmr.msrb.gmra.mxu0 %v2726_v51  ;;  %v1957_v55 = vld [vmem:[#allocation8 + $0x268] sm:$0xf]  ;;  %v1686_v58 = vor.u32 %v2302_v49, %v1685_v48  ;;  %v2358_v37 = vld [vmem:[#allocation8 + $0x214] sm:$0xf0]  ;;  %v1735_v48 = vld [vmem:[#allocation8 + $0xb8] sm:$0xf0] }
  0xb4   :  { %v222_v60 = vpop.f32.mrf.mxu2  ;;  %1051 = vmatmul.bf16.vlgmr.msrb.gmra.mxu1 %v2728_v56  ;;  %1141 = vmatpush.bf16.msrb.mxu0 %v1766_v50  ;;  %v1813_v50 = vld [vmem:[#allocation8 + $0x148] sm:$0xf]  ;;  %v1958_v2 = vor.u32 %v2370_v57, %v1957_v55  ;;  %v2390_v39 = vld [vmem:[#allocation8 + $0x314] sm:$0xf0]  ;;  %v2344_v49 = vld [vmem:[#allocation8 + $0x1ac] sm:$0xf] }
  0xb5   :  { %v223_v61 = vadd.f32 %v222_v60, %v133_v43  ;;  %v236_v62 = vpop.f32.mrf.mxu3  ;;  %1155 = vmatpush.bf16.msrb.mxu1 %v1894_v52  ;;  %v2374_v43 = vld [vmem:[#allocation8 + $0x294] sm:$0xf0]  ;;  %v2085_v60 = vld [vmem:[#allocation8 + $0x368] sm:$0xf]  ;;  %v2380_v55 = vld [vmem:[#allocation8 + $0x2cc] sm:$0xf] }
  0xb6   :  { %v237_v3 = vadd.f32 %v236_v62, %v134_v47  ;;  %v2406_v47 = vld [vmem:[#allocation8 + $0x394] sm:$0xf0]  ;;  %v1974_v53 = vor.u32 %v2374_v43, %v1973_v42  ;;  %v1669_v62 = vld [vmem:[#allocation8 + $0x28] sm:$0xf]  ;;  %v2007_v57 = vld [vmem:[#allocation8 + $0x2d8] sm:$0xf0] }
  0xb7   :  { %v245_v9 = vmax.f32 %v223_v61, 0.0  ;;  %v2334_v52 = vld [vmem:[#allocation8 + $0x154] sm:$0xf0]  ;;  %v2102_v54 = vor.u32 %v2406_v47, %v2101_v46  ;;  %v1909_v36 = vld [vmem:[#allocation8 + $0x208] sm:$0xf] }
  0xb8   :  { %v246_v13 = vmax.f32 %v237_v3, 0.0  ;;  %1142 = vmatpush.bf16.msrb.mxu0 %v1750_v63  ;;  %v1814_v59 = vor.u32 %v2334_v52, %v1813_v50  ;;  %v2402_v61 = vld [vmem:[#allocation8 + $0x374] sm:$0xf0]  ;;  %v2037_v38 = vld [vmem:[#allocation8 + $0x308] sm:$0xf]  ;;  %v1910_v47 = vor.u32 %v2358_v37, %v1909_v36 }
  0xb9   :  { %v2732_v15 = vpack.c.bf16 %v245_v9, %v241_v8  ;;  %1156 = vmatpush.bf16.msrb.mxu1 %v1878_v4  ;;  %v2298_v63 = vld [vmem:[#allocation8 + $0x34] sm:$0xf0]  ;;  %v2086_v3 = vor.u32 %v2402_v61, %v2085_v60  ;;  %v1941_v4 = vld [vmem:[#allocation8 + $0x248] sm:$0xf]  ;;  %v1798_v8 = vor.u32 %v2330_v1, %v1797_v0  ;;  %v2312_v46 = vld [vmem:[#allocation8 + $0xac] sm:$0xf]  ;;  %v2038_v52 = vor.u32 %v2390_v39, %v2037_v38 }
  0xba   :  { %v2734_v21 = vpack.c.bf16 %v246_v13, %v242_v12  ;;  %v1670_v7 = vor.u32 %v2298_v63, %v1669_v62  ;;  %v2398_v9 = vld [vmem:[#allocation8 + $0x354] sm:$0xf0]  ;;  %v1781_v12 = vld [vmem:[#allocation8 + $0x108] sm:$0xf]  ;;  %v1863_v50 = vld [vmem:[#allocation8 + $0x1b8] sm:$0xf0] }
  0xbb   :  { %1065 = vmatmul.bf16.vlgmr.msrb.gmra.mxu2 %v2732_v15  ;;  %v2326_v13 = vld [vmem:[#allocation8 + $0x114] sm:$0xf0]  ;;  %v2070_v20 = vor.u32 %v2398_v9, %v2069_v6  ;;  %v2412_v60 = vld [vmem:[#allocation8 + $0x3cc] sm:$0xf]  ;;  %v2135_v61 = vld [vmem:[#allocation8 + $0x3d8] sm:$0xf0] }
  0xbc   :  { %1079 = vmatmul.bf16.vlgmr.msrb.gmra.mxu3 %v2734_v21  ;;  %1169 = vmatpush.bf16.msrb.mxu2 %v2022_v14  ;;  %v2320_v14 = vld [vmem:[#allocation8 + $0xec] sm:$0xf]  ;;  %v1782_v25 = vor.u32 %v2326_v13, %v1781_v12  ;;  %v1719_v63 = vld [vmem:[#allocation8 + $0x98] sm:$0xf0] }
  0xbd   :  { %1183 = vmatpush.bf16.msrb.mxu3 %v2150_v16  ;;  %1143 = vmatpush.bf16.msrb.mxu0 %v1734_v17  ;;  %v1942_v16 = vor.u32 %v2366_v5, %v1941_v4  ;;  %v1767_v17 = vld [vmem:[#allocation8 + $0xf8] sm:$0xf0]  ;;  %v2308_v62 = vld [vmem:[#allocation8 + $0x8c] sm:$0xf] }
  0xbe   :  { %1157 = vmatpush.bf16.msrb.mxu1 %v1862_v22  ;;  %v1925_v22 = vld [vmem:[#allocation8 + $0x228] sm:$0xf]  ;;  %v2340_v0 = vld [vmem:[#allocation8 + $0x18c] sm:$0xf]  ;;  %v1847_v1 = vld [vmem:[#allocation8 + $0x198] sm:$0xf0]  ;;  %v1722_v6 = vor.u32 %v2308_v62, %v1719_v63 }
  0xbf   :  { %v1926_v31 = vor.u32 %v2362_v23, %v1925_v22  ;;  %v2376_v4 = vld [vmem:[#allocation8 + $0x2ac] sm:$0xf]  ;;  %v1991_v5 = vld [vmem:[#allocation8 + $0x2b8] sm:$0xf0] }
  0xc0   :  { %1170 = vmatpush.bf16.msrb.mxu2 %v2006_v28  ;;  %v1770_v28 = vor.u32 %v2320_v14, %v1767_v17  ;;  %v2119_v9 = vld [vmem:[#allocation8 + $0x3b8] sm:$0xf0]  ;;  %v2336_v12 = vld [vmem:[#allocation8 + $0x16c] sm:$0xf]  ;;  %v1994_v14 = vor.u32 %v2376_v4, %v1991_v5 }
  0xc1   :  { %1184 = vmatpush.bf16.msrb.mxu3 %v2134_v29  ;;  %1144 = vmatpush.bf16.msrb.mxu0 %v1718_v30  ;;  %v1898_v29 = vor.u32 %v2352_v18, %v1895_v19  ;;  %v2316_v30 = vld [vmem:[#allocation8 + $0xcc] sm:$0xf]  ;;  %v1831_v13 = vld [vmem:[#allocation8 + $0x178] sm:$0xf0]  ;;  %v1706_v19 = vor.u32 %v2304_v10, %v1703_v11 }
  0xc2   :  { %1158 = vmatpush.bf16.msrb.mxu1 %v1846_v33  ;;  %v2348_v33 = vld [vmem:[#allocation8 + $0x1cc] sm:$0xf]  ;;  %v1754_v42 = vor.u32 %v2316_v30, %v1751_v32  ;;  %v1975_v18 = vld [vmem:[#allocation8 + $0x298] sm:$0xf0] }
  0xc3   :  { %1093 = vmatmul.bf16.vlgmr.msra.gmra.mxu0 %v2726_v51  ;;  %v1882_v43 = vor.u32 %v2348_v33, %v1879_v34  ;;  %v2372_v17 = vld [vmem:[#allocation8 + $0x28c] sm:$0xf]  ;;  %v2103_v23 = vld [vmem:[#allocation8 + $0x398] sm:$0xf0] }
  0xc4   :  { %1171 = vmatpush.bf16.msrb.mxu2 %v1990_v40  ;;  %1107 = vmatmul.bf16.vlgmr.msra.gmra.mxu1 %v2728_v56  ;;  %v2384_v40 = vld [vmem:[#allocation8 + $0x2ec] sm:$0xf]  ;;  %v1815_v27 = vld [vmem:[#allocation8 + $0x158] sm:$0xf0] }
  0xc5   :  { %1185 = vmatpush.bf16.msrb.mxu3 %v2118_v41  ;;  %1145 = vmatpush.bf16.msrb.mxu0 %v1702_v44  ;;  %v2023_v41 = vld [vmem:[#allocation8 + $0x2f8] sm:$0xf0]  ;;  %v2416_v44 = vld [vmem:[#allocation8 + $0x3ec] sm:$0xf]  ;;  %v1818_v33 = vor.u32 %v2332_v26, %v1815_v27  ;;  %v2427_v27 = vld [vmem:[#allocation11 + $0x40] sm:$0xff] }
  0xc6   :  { %1159 = vmatpush.bf16.msrb.mxu1 %v1830_v45  ;;  %v2151_v45 = vld [vmem:[#allocation8 + $0x3f8] sm:$0xf0]  ;;  %v2404_v22 = vld [vmem:[#allocation8 + $0x38c] sm:$0xf] }
  0xc7   :  { %v2368_v30 = vld [vmem:[#allocation8 + $0x26c] sm:$0xf]  ;;  %v1671_v37 = vld [vmem:[#allocation8 + $0x38] sm:$0xf0] }
  0xc8   :  { %1172 = vmatpush.bf16.msrb.mxu2 %v1974_v53  ;;  %v2026_v53 = vor.u32 %v2384_v40, %v2023_v41  ;;  %v2400_v34 = vld [vmem:[#allocation8 + $0x36c] sm:$0xf]  ;;  %v1799_v39 = vld [vmem:[#allocation8 + $0x138] sm:$0xf0] }
  0xc9   :  { %1186 = vmatpush.bf16.msrb.mxu3 %v2102_v54  ;;  %1146 = vmatpush.bf16.msrb.mxu0 %v1686_v58  ;;  %v2154_v54 = vor.u32 %v2416_v44, %v2151_v45  ;;  %v1738_v58 = vor.u32 %v2312_v46, %v1735_v48  ;;  %v2296_v36 = vld [vmem:[#allocation8 + $0x2c] sm:$0xf]  ;;  %v2426_v62 = vld [vmem:[#allocation11 + $0x38] sm:$0xff] }
  0xca   :  { %1160 = vmatpush.bf16.msrb.mxu1 %v1814_v59  ;;  %v1866_v59 = vor.u32 %v2344_v49, %v1863_v50  ;;  %v2328_v38 = vld [vmem:[#allocation8 + $0x12c] sm:$0xf]  ;;  %v1674_v44 = vor.u32 %v2296_v36, %v1671_v37  ;;  %v1655_v49 = vld [vmem:[#allocation8 + $0x18] sm:$0xf0] }
  0xcb   :  { %1121 = vmatmul.bf16.vlgmr.msra.gmra.mxu2 %v2732_v15  ;;  %v1802_v45 = vor.u32 %v2328_v38, %v1799_v39  ;;  %v2396_v46 = vld [vmem:[#allocation8 + $0x34c] sm:$0xf]  ;;  %v2039_v4 = vld [vmem:[#allocation8 + $0x318] sm:$0xf0]  ;;  %v2437_v38 = vld [vmem:[#allocation11 + $0x90] sm:$0xff] }
  0xcc   :  { %1135 = vmatmul.bf16.vlgmr.msra.gmra.mxu3 %v2734_v21  ;;  %1173 = vmatpush.bf16.msrb.mxu2 %v1958_v2  ;;  %v2010_v2 = vor.u32 %v2380_v55, %v2007_v57  ;;  %v2292_v48 = vld [vmem:[#allocation8 + $0xc] sm:$0xf]  ;;  %v1927_v57 = vld [vmem:[#allocation8 + $0x238] sm:$0xf0] }
  0xcd   :  { %1187 = vmatpush.bf16.msrb.mxu3 %v2086_v3  ;;  %1147 = vmatpush.bf16.msrb.mxu0 %v1670_v7  ;;  %v2138_v3 = vor.u32 %v2412_v60, %v2135_v61  ;;  %v1850_v7 = vor.u32 %v2340_v0, %v1847_v1  ;;  %v2324_v50 = vld [vmem:[#allocation8 + $0x10c] sm:$0xf]  ;;  %v2055_v61 = vld [vmem:[#allocation8 + $0x338] sm:$0xf0] }
  0xce   :  { %1161 = vmatpush.bf16.msrb.mxu1 %v1798_v8  ;;  %v2408_v8 = vld [vmem:[#allocation8 + $0x3ac] sm:$0xf]  ;;  %v2422_v10 = vld [vmem:[#allocation11 + $0x18] sm:$0xff] }
  0xcf   :  { %v2360_v55 = vld [vmem:[#allocation8 + $0x22c] sm:$0xf]  ;;  %v2434_v11 = vld [vmem:[#allocation11 + $0x78] sm:$0xff] }
  0xd0   :  { %1174 = vmatpush.bf16.msrb.mxu2 %v1942_v16  ;;  %v2122_v16 = vor.u32 %v2408_v8, %v2119_v9  ;;  %v2392_v60 = vld [vmem:[#allocation8 + $0x32c] sm:$0xf]  ;;  %v1930_v63 = vor.u32 %v2360_v55, %v1927_v57  ;;  %v2423_v9 = vld [vmem:[#allocation11 + $0x20] sm:$0xff] }
  0xd1   :  { %1188 = vmatpush.bf16.msrb.mxu3 %v2070_v20  ;;  %1148 = vmatpush.bf16.msrb.mxu0 %v1654_v24  ;;  %v1834_v20 = vor.u32 %v2336_v12, %v1831_v13  ;;  %v2300_v24 = vld [vmem:[#allocation8 + $0x4c] sm:$0xf]  ;;  %v2058_v0 = vor.u32 %v2392_v60, %v2055_v61  ;;  %v2433_v12 = vld [vmem:[#allocation11 + $0x70] sm:$0xff] }
  0xd2   :  { %1162 = vmatpush.bf16.msrb.mxu1 %v1782_v25  ;;  %v1687_v25 = vld [vmem:[#allocation8 + $0x58] sm:$0xf0]  ;;  %v2356_v1 = vld [vmem:[#allocation8 + $0x20c] sm:$0xf] }
  0xd3   :  { %v1690_v32 = vor.u32 %v2300_v24, %v1687_v25  ;;  %v2424_v8 = vld [vmem:[#allocation11 + $0x28] sm:$0xff] }
  0xd4   :  { %1175 = vmatpush.bf16.msrb.mxu2 %v1926_v31  ;;  %1149 = vmatmul.bf16.vlgmr.msrb.gmra.mxu0 %v2726_v51  ;;  %v1959_v31 = vld [vmem:[#allocation8 + $0x278] sm:$0xf0]  ;;  %v2432_v13 = vld [vmem:[#allocation11 + $0x68] sm:$0xff] }
  0xd5   :  { %1197 = vmatpush.bf16.msra.mxu0 %v1770_v28  ;;  %1189 = vmatpush.bf16.msrb.mxu3 %v2054_v35  ;;  %v1978_v28 = vor.u32 %v2372_v17, %v1975_v18  ;;  %v2087_v35 = vld [vmem:[#allocation8 + $0x378] sm:$0xf0]  ;;  %v1962_v40 = vor.u32 %v2368_v30, %v1959_v31  ;;  %v2440_v24 = vld [vmem:[#allocation11 + $0xa8] sm:$0xff] }
  0xd6   :  { %1211 = vmatpush.bf16.msra.mxu1 %v1898_v29  ;;  %v2106_v29 = vor.u32 %v2404_v22, %v2103_v23  ;;  %v2090_v41 = vor.u32 %v2400_v34, %v2087_v35  ;;  %v2750_v22 = vld [vmem:[#allocation10] sm:$0xf]  ;;  %v2428_v23 = vld [vmem:[#allocation11 + $0x48] sm:$0xff] }
  0xd7   :  { %1163 = vmatmul.bf16.vlgmr.msrb.gmra.mxu1 %v2728_v56  ;;  %v381_v25 = vperm.slane %v2750_v22, 0 }
  0xd8   :  { %1176 = vmatpush.bf16.msrb.mxu2 %v1910_v47  ;;  %v2071_v47 = vld [vmem:[#allocation8 + $0x358] sm:$0xf0] }
  0xd9   :  { %1198 = vmatpush.bf16.msra.mxu0 %v1754_v42  ;;  %1190 = vmatpush.bf16.msrb.mxu3 %v2038_v52  ;;  %v2364_v42 = vld [vmem:[#allocation8 + $0x24c] sm:$0xf]  ;;  %v1783_v52 = vld [vmem:[#allocation8 + $0x118] sm:$0xf0] }
  0xda   :  { %1212 = vmatpush.bf16.msra.mxu1 %v1882_v43  ;;  %v1943_v43 = vld [vmem:[#allocation8 + $0x258] sm:$0xf0] }
  0xdb   :  { %1177 = vmatmul.bf16.vlgmr.msrb.gmra.mxu2 %v2732_v15 }
  0xdc   :  { %1225 = vmatpush.bf16.msra.mxu2 %v2026_v53  ;;  %1191 = vmatmul.bf16.vlgmr.msrb.gmra.mxu3 %v2734_v21  ;;  %v1946_v53 = vor.u32 %v2364_v42, %v1943_v43 }
  0xdd   :  { %1239 = vmatpush.bf16.msra.mxu3 %v2154_v54  ;;  %1199 = vmatpush.bf16.msra.mxu0 %v1738_v58  ;;  %v2074_v54 = vor.u32 %v2396_v46, %v2071_v47  ;;  %v1658_v58 = vor.u32 %v2292_v48, %v1655_v49  ;;  %v382_v46 = vperm.slane %v2750_v22, 1 }
  0xde   :  { %1213 = vmatpush.bf16.msra.mxu1 %v1866_v59  ;;  %v1786_v59 = vor.u32 %v2324_v50, %v1783_v52  ;;  %v2435_v52 = vld [vmem:[#allocation11 + $0x80] sm:$0xff] }
  0xe0   :  { %1226 = vmatpush.bf16.msra.mxu2 %v2010_v2  ;;  %v1911_v2 = vld [vmem:[#allocation8 + $0x218] sm:$0xf0] }
  0xe1   :  { %1240 = vmatpush.bf16.msra.mxu3 %v2138_v3  ;;  %1200 = vmatpush.bf16.msra.mxu0 %v1722_v6  ;;  %v2388_v3 = vld [vmem:[#allocation8 + $0x30c] sm:$0xf]  ;;  %v1914_v5 = vor.u32 %v2356_v1, %v1911_v2 }
  0xe2   :  { %1214 = vmatpush.bf16.msra.mxu1 %v1850_v7  ;;  %v2042_v6 = vor.u32 %v2388_v3, %v2039_v4  ;;  %v2425_v7 = vld [vmem:[#allocation11 + $0x30] sm:$0xff] }
  0xe4   :  { %1227 = vmatpush.bf16.msra.mxu2 %v1994_v14  ;;  %v2430_v14 = vld [vmem:[#allocation11 + $0x58] sm:$0xff] }
  0xe5   :  { %1241 = vmatpush.bf16.msra.mxu3 %v2122_v16  ;;  %1201 = vmatpush.bf16.msra.mxu0 %v1706_v19  ;;  %v2442_v16 = vld [vmem:[#allocation11 + $0xb8] sm:$0xff]  ;;  %v2429_v19 = vld [vmem:[#allocation11 + $0x50] sm:$0xff] }
  0xe6   :  { %1215 = vmatpush.bf16.msra.mxu1 %v1834_v20  ;;  %v2441_v20 = vld [vmem:[#allocation11 + $0xb0] sm:$0xff] }
  0xe8   :  { %1228 = vmatpush.bf16.msra.mxu2 %v1978_v28  ;;  %v2439_v28 = vld [vmem:[#allocation11 + $0xa0] sm:$0xff] }
  0xe9   :  { %1242 = vmatpush.bf16.msra.mxu3 %v2106_v29  ;;  %1202 = vmatpush.bf16.msra.mxu0 %v1690_v32 }
  0xea   :  { %1216 = vmatpush.bf16.msra.mxu1 %v1818_v33  ;;  %v2438_v33 = vld [vmem:[#allocation11 + $0x98] sm:$0xff] }
  0xec   :  { %1229 = vmatpush.bf16.msra.mxu2 %v1962_v40 }
  0xed   :  { %1243 = vmatpush.bf16.msra.mxu3 %v2090_v41  ;;  %1203 = vmatpush.bf16.msra.mxu0 %v1674_v44 }
  0xee   :  { %1217 = vmatpush.bf16.msra.mxu1 %v1802_v45  ;;  %v2436_v45 = vld [vmem:[#allocation11 + $0x88] sm:$0xff] }
  0xf0   :  { %1230 = vmatpush.bf16.msra.mxu2 %v1946_v53  ;;  %v2450_v53 = vld [vmem:[#allocation11 + $0xf8] sm:$0xff] }
  0xf1   :  { %1244 = vmatpush.bf16.msra.mxu3 %v2074_v54  ;;  %1204 = vmatpush.bf16.msra.mxu0 %v1658_v58 }
  0xf2   :  { %1218 = vmatpush.bf16.msra.mxu1 %v1786_v59  ;;  %v2449_v59 = vld [vmem:[#allocation11 + $0xf0] sm:$0xff] }
  0xf4   :  { %1231 = vmatpush.bf16.msra.mxu2 %v1930_v63  ;;  %1205 = vmatmul.bf16.vlgmr.msra.gmra.mxu0 %v2726_v51  ;;  %v2421_v51 = vld [vmem:[#allocation11 + $0x10] sm:$0xff]  ;;  %v2448_v63 = vld [vmem:[#allocation11 + $0xe8] sm:$0xff] }
  0xf5   :  { %1525 = vmatpush.bf16.msrb.mxu0 %v2426_v62  ;;  %1245 = vmatpush.bf16.msra.mxu3 %v2058_v0 }
  0xf6   :  { %1219 = vmatmul.bf16.vlgmr.msra.gmra.mxu1 %v2728_v56  ;;  %v2420_v56 = vld [vmem:[#allocation11 + $0x8] sm:$0xff] }
  0xf7   :  { %1539 = vmatpush.bf16.msrb.mxu1 %v2434_v11 }
  0xf8   :  { %1232 = vmatpush.bf16.msra.mxu2 %v1914_v5 }
  0xf9   :  { %1246 = vmatpush.bf16.msra.mxu3 %v2042_v6  ;;  %1526 = vmatpush.bf16.msrb.mxu0 %v2425_v7  ;;  %v2447_v7 = vld [vmem:[#allocation11 + $0xe0] sm:$0xff] }
  0xfb   :  { %1233 = vmatmul.bf16.vlgmr.msra.gmra.mxu2 %v2732_v15  ;;  %1540 = vmatpush.bf16.msrb.mxu1 %v2433_v12  ;;  %v2419_v15 = vld [vmem:[#allocation11] sm:$0xff]  ;;  %v2446_v12 = vld [vmem:[#allocation11 + $0xd8] sm:$0xff] }
  0xfc   :  { %1247 = vmatmul.bf16.vlgmr.msra.gmra.mxu3 %v2734_v21  ;;  %v2431_v21 = vld [vmem:[#allocation11 + $0x60] sm:$0xff]  ;;  %1553 = vmatpush.bf16.msrb.mxu2 %v2442_v16  ;;  %v2445_v16 = vld [vmem:[#allocation11 + $0xd0] sm:$0xff] }
  0xfd   :  { %1527 = vmatpush.bf16.msrb.mxu0 %v2424_v8  ;;  %1567 = vmatpush.bf16.msrb.mxu3 %v2450_v53 }
  0xff   :  { %1541 = vmatpush.bf16.msrb.mxu1 %v2432_v13 }
 0x100   :  { %1554 = vmatpush.bf16.msrb.mxu2 %v2441_v20  ;;  %v2444_v20 = vld [vmem:[#allocation11 + $0xc8] sm:$0xff] }
 0x101   :  { %1528 = vmatpush.bf16.msrb.mxu0 %v2423_v9  ;;  %1568 = vmatpush.bf16.msrb.mxu3 %v2449_v59  ;;  %v383_v9 = vperm.slane %v2750_v22, 2 }
 0x103   :  { %1542 = vmatpush.bf16.msrb.mxu1 %v2431_v21 }
 0x104   :  { %1555 = vmatpush.bf16.msrb.mxu2 %v2440_v24 }
 0x105   :  { %1529 = vmatpush.bf16.msrb.mxu0 %v2422_v10  ;;  %1569 = vmatpush.bf16.msrb.mxu3 %v2448_v63 }
 0x107   :  { %1543 = vmatpush.bf16.msrb.mxu1 %v2430_v14 }
 0x108   :  { %1556 = vmatpush.bf16.msrb.mxu2 %v2439_v28  ;;  %v2443_v28 = vld [vmem:[#allocation11 + $0xc0] sm:$0xff] }
 0x109   :  { %1530 = vmatpush.bf16.msrb.mxu0 %v2421_v51  ;;  %1570 = vmatpush.bf16.msrb.mxu3 %v2447_v7 }
 0x10b   :  { %1544 = vmatpush.bf16.msrb.mxu1 %v2429_v19 }
 0x10c   :  { %1557 = vmatpush.bf16.msrb.mxu2 %v2438_v33 }
 0x10d   :  { %1531 = vmatpush.bf16.msrb.mxu0 %v2420_v56  ;;  %1571 = vmatpush.bf16.msrb.mxu3 %v2446_v12 }
 0x10f   :  { %1545 = vmatpush.bf16.msrb.mxu1 %v2428_v23 }
 0x110   :  { %1558 = vmatpush.bf16.msrb.mxu2 %v2437_v38 }
 0x111   :  { %1532 = vmatpush.bf16.msrb.mxu0 %v2419_v15  ;;  %1572 = vmatpush.bf16.msrb.mxu3 %v2445_v16 }
 0x113   :  { %1546 = vmatpush.bf16.msrb.mxu1 %v2427_v27 }
 0x114   :  { %1559 = vmatpush.bf16.msrb.mxu2 %v2436_v45 }
 0x115   :  { %1573 = vmatpush.bf16.msrb.mxu3 %v2444_v20 }
 0x118   :  { %1560 = vmatpush.bf16.msrb.mxu2 %v2435_v52 }
 0x119   :  { %1574 = vmatpush.bf16.msrb.mxu3 %v2443_v28 }
 0x130   :  { %v1038_v17 = vpop.f32.mrf.mxu0 }
 0x131   :  { %v1052_v18 = vpop.f32.mrf.mxu1  ;;  %v1039_v29 = vadd.f32 %v1038_v17, %v381_v25 }
 0x133   :  { %v1053_v34 = vadd.f32 %v1052_v18, %v1039_v29 }
 0x138   :  { %v1040_v26 = vpop.f32.mrf.mxu0 }
 0x139   :  { %v1054_v30 = vpop.f32.mrf.mxu1  ;;  %v1041_v35 = vadd.f32 %v1040_v26, %v381_v25 }
 0x13b   :  { %v1055_v39 = vadd.f32 %v1054_v30, %v1041_v35  ;;  %v384_v35 = vperm.slane %v2750_v22, 3 }
 0x13e   :  { %v1066_v31 = vpop.f32.mrf.mxu2 }
 0x13f   :  { %v1080_v32 = vpop.f32.mrf.mxu3  ;;  %v1067_v37 = vadd.f32 %v1066_v31, %v1053_v34 }
 0x140   :  { %v1094_v36 = vpop.f32.mrf.mxu0 }
 0x141   :  { %v1081_v41 = vadd.f32 %v1080_v32, %v1067_v37  ;;  %v1108_v42 = vpop.f32.mrf.mxu1  ;;  %v1095_v54 = vadd.f32 %v1094_v36, %v382_v46 }
 0x143   :  { %v1253_v49 = vmax.f32 %v1081_v41, 0.0  ;;  %v1109_v60 = vadd.f32 %v1108_v42, %v1095_v54 }
 0x146   :  { %v1068_v40 = vpop.f32.mrf.mxu2 }
 0x147   :  { %v1069_v43 = vadd.f32 %v1068_v40, %v1055_v39  ;;  %v1082_v44 = vpop.f32.mrf.mxu3 }
 0x148   :  { %v1096_v48 = vpop.f32.mrf.mxu0 }
 0x149   :  { %v1083_v47 = vadd.f32 %v1082_v44, %v1069_v43  ;;  %v1097_v61 = vadd.f32 %v1096_v48, %v382_v46  ;;  %v1110_v62 = vpop.f32.mrf.mxu1 }
 0x14b   :  { %v1257_v50 = vmax.f32 %v1083_v47, 0.0  ;;  %v1111_v2 = vadd.f32 %v1110_v62, %v1097_v61 }
 0x14d   :  { %v1261_v55 = vpack.c.bf16 %v1257_v50, %v1253_v49 }
 0x14e   :  { %v1122_v57 = vpop.f32.mrf.mxu2 }
 0x14f   :  { %v1136_v58 = vpop.f32.mrf.mxu3  ;;  %1533 = vmatmul.bf16.vlgmr.msrb.gmra.mxu0 %v1261_v55  ;;  %v1123_v0 = vadd.f32 %v1122_v57, %v1109_v60 }
 0x151   :  { %v1150_v1 = vpop.f32.mrf.mxu0  ;;  %v1137_v4 = vadd.f32 %v1136_v58, %v1123_v0  ;;  %v2469_v58 = vld [vmem:[%s2771_s6] ss:$0 sm:$0xff] }
 0x152   :  { %v1151_v13 = vadd.f32 %v1150_v1, %v383_v9 }
 0x153   :  { %v1254_v10 = vmax.f32 %v1137_v4, 0.0 }
 0x154   :  { %v1164_v11 = vpop.f32.mrf.mxu1 }
 0x155   :  { %v1165_v17 = vadd.f32 %v1164_v11, %v1151_v13 }
 0x156   :  { %v1124_v3 = vpop.f32.mrf.mxu2 }
 0x157   :  { %v1125_v5 = vadd.f32 %v1124_v3, %v1111_v2  ;;  %v1138_v6 = vpop.f32.mrf.mxu3 }
 0x159   :  { %v1139_v8 = vadd.f32 %v1138_v6, %v1125_v5  ;;  %v1152_v15 = vpop.f32.mrf.mxu0 }
 0x15a   :  { %v1153_v18 = vadd.f32 %v1152_v15, %v383_v9 }
 0x15b   :  { %v1258_v51 = vmax.f32 %v1139_v8, 0.0 }
 0x15c   :  { %v1166_v23 = vpop.f32.mrf.mxu1 }
 0x15d   :  { %v1262_v56 = vpack.c.bf16 %v1258_v51, %v1254_v10  ;;  %v1167_v24 = vadd.f32 %v1166_v23, %v1153_v18 }
 0x15e   :  { %v1178_v21 = vpop.f32.mrf.mxu2 }
 0x15f   :  { %v1192_v14 = vpop.f32.mrf.mxu3  ;;  %1547 = vmatmul.bf16.vlgmr.msrb.gmra.mxu1 %v1262_v56  ;;  %v1179_v19 = vadd.f32 %v1178_v21, %v1165_v17 }
 0x161   :  { %v1193_v26 = vadd.f32 %v1192_v14, %v1179_v19 }
 0x163   :  { %v1255_v31 = vmax.f32 %v1193_v26, 0.0 }
 0x166   :  { %v1180_v25 = vpop.f32.mrf.mxu2 }
 0x167   :  { %v1181_v27 = vadd.f32 %v1180_v25, %v1167_v24  ;;  %v1194_v29 = vpop.f32.mrf.mxu3 }
 0x169   :  { %v1195_v30 = vadd.f32 %v1194_v29, %v1181_v27 }
 0x16b   :  { %v1259_v32 = vmax.f32 %v1195_v30, 0.0 }
 0x16d   :  { %v1263_v33 = vpack.c.bf16 %v1259_v32, %v1255_v31 }
 0x16f   :  { %1561 = vmatmul.bf16.vlgmr.msrb.gmra.mxu2 %v1263_v33 }
 0x171   :  { %v1206_v34 = vpop.f32.mrf.mxu0 }
 0x172   :  { %v1207_v37 = vadd.f32 %v1206_v34, %v384_v35 }
 0x173   :  { %v1220_v36 = vpop.f32.mrf.mxu1 }
 0x174   :  { %v1221_v41 = vadd.f32 %v1220_v36, %v1207_v37 }
 0x179   :  { %v1208_v38 = vpop.f32.mrf.mxu0 }
 0x17a   :  { %v1209_v42 = vadd.f32 %v1208_v38, %v384_v35 }
 0x17b   :  { %v1222_v44 = vpop.f32.mrf.mxu1 }
 0x17c   :  { %v1223_v45 = vadd.f32 %v1222_v44, %v1209_v42 }
 0x17e   :  { %v1234_v39 = vpop.f32.mrf.mxu2 }
 0x17f   :  { %v1248_v40 = vpop.f32.mrf.mxu3  ;;  %v1235_v43 = vadd.f32 %v1234_v39, %v1221_v41 }
 0x181   :  { %v1249_v47 = vadd.f32 %v1248_v40, %v1235_v43 }
 0x183   :  { %v1256_v52 = vmax.f32 %v1249_v47, 0.0 }
 0x186   :  { %v1236_v46 = vpop.f32.mrf.mxu2 }
 0x187   :  { %v1237_v48 = vadd.f32 %v1236_v46, %v1223_v45  ;;  %v1250_v49 = vpop.f32.mrf.mxu3 }
 0x189   :  { %v1251_v50 = vadd.f32 %v1250_v49, %v1237_v48 }
 0x18b   :  { %v1260_v53 = vmax.f32 %v1251_v50, 0.0 }
 0x18d   :  { %v1264_v54 = vpack.c.bf16 %v1260_v53, %v1256_v52 }
 0x18f   :  { %1575 = vmatmul.bf16.vlgmr.msrb.gmra.mxu3 %v1264_v54 }
 0x1cc   :  { %v1534_v22 = vpop.f32.mrf.mxu0 }
 0x1cd   :  { %v1535_v62 = vadd.f32 %v2469_v58, %v1534_v22 }
 0x1d4   :  { %v1536_v59 = vpop.f32.mrf.mxu0 }
 0x1d5   :  { %v1537_v63 = vadd.f32 %v2469_v58, %v1536_v59 }
 0x1dc   :  { %v1548_v55 = vpop.f32.mrf.mxu1 }
 0x1dd   :  { %v1549_v1 = vadd.f32 %v1548_v55, %v1535_v62 }
 0x1e4   :  { %v1550_v61 = vpop.f32.mrf.mxu1 }
 0x1e5   :  { %v1551_v2 = vadd.f32 %v1550_v61, %v1537_v63 }
 0x1f2   :  { %v1562_v57 = vpop.f32.mrf.mxu2 }
 0x1f3   :  { %v1563_v3 = vadd.f32 %v1562_v57, %v1549_v1 }
 0x1fa   :  { %v1564_v0 = vpop.f32.mrf.mxu2 }
 0x1fb   :  { %v1565_v4 = vadd.f32 %v1564_v0, %v1551_v2 }
 0x212   :  { %v1576_v60 = vpop.f32.mrf.mxu3 }
 0x213   :  { %v1577_v6 = vadd.f32 %v1576_v60, %v1563_v3 }
 0x21a   :  { %v1578_v5 = vpop.f32.mrf.mxu3 }
 0x21b   :  { %v1579_v7 = vadd.f32 %v1578_v5, %v1565_v4 }
 0x21d   :  { %v2454_v8 = vpack.c.bf16 %v1579_v7, %v1577_v6 }
 0x21f   :  { %2455 = vst [vmem:[#allocation13] sm:$0xff] %v2454_v8  }
 0x220   :  { %1597 = dma.vmem_to_hbm [thread:$0]  %s1590_s11, 128, %s1592_s14, [#allocation4], %s2658_s8, %s2658_s8, %s2659_s9  }
 0x221   :  { %2646 = dma.done.wait [#allocation4], 128  }
 0x222   :  { %2647 = vsyncadd [#allocation4], 4294967168 }
 0x223   :  { %1602 = vsyncpa [#allocation3], 1 }
 0x224   :  { %1603 = vsyncpa [#allocation6], 1 }
 0x225   :  { %1604 = vsyncpa [#allocation9], 1 }
 0x226   :  { %1605 = vsyncpa [#allocation12], 1 }
 0x227   :  { %1606 = vsyncpa [#allocation4], 1 }

</bundles_post_ra>
